<compile_context>
chip_gen: v7x
topology: tpu7x:2x2x1
jax: 0.10.0
libtpu: 0.0.40
codegen_flags: <defaults>
</compile_context>

<pallas_src>
import functools

import jax
import jax.numpy as jnp
from jax import lax
from jax.experimental import pallas as pl
from jax.experimental.pallas import tpu as pltpu

_VMEM_LIMIT_BYTES = 48 * 1024 * 1024  # below physical VMEM on v5e/v6e (128 MiB) and v7x (64 MiB)


# ----------------------------- Shared in-kernel attention + fc_out -------------------
def _attend_and_project(q, k, v, mask0, wo, bo, acc_ref, *, heads, head_dim,
                        neg_fill, out_dtype):
    """q: (Lq, E) bf16, k/v: (Lk, E) bf16 (q pre-scaled by 1/sqrt(E) via its weights),
    mask0: (Lq, Lk) bool (True => masked out), wo: (E, E) bf16, bo: (1, E) f32,
    acc_ref: (Lq, E) f32 VMEM scratch.  Returns final (Lq, E) in out_dtype."""
    for h in range(heads):
        lo, hi = h * head_dim, (h + 1) * head_dim
        qh = q[:, lo:hi]                                  # (Lq, D) bf16
        kh = k[:, lo:hi]                                  # (Lk, D) bf16
        vh = v[:, lo:hi]                                  # (Lk, D) bf16
        # q @ k^T without an explicit transpose: contract the last dims directly.
        energy = lax.dot_general(
            qh, kh, dimension_numbers=(((1,), (1,)), ((), ())),
            preferred_element_type=jnp.float32)           # (Lq, Lk) f32
        energy = jnp.where(mask0, neg_fill, energy)
        e_max = jnp.max(energy, axis=-1, keepdims=True)
        p = jnp.exp(energy - e_max)                       # softmax kept in f32
        denom = jnp.sum(p, axis=-1, keepdims=True)
        att = p * pl.reciprocal(denom, approx=True)       # divide on EUP slot
        acc_ref[:, lo:hi] = jnp.dot(att.astype(vh.dtype), vh,
                                    preferred_element_type=jnp.float32)
    # Fused output projection (fc_out): one lane-dense (Lq, E) result per grid step.
    out = jnp.dot(acc_ref[...].astype(jnp.bfloat16), wo,
                  preferred_element_type=jnp.float32) + bo
    return out.astype(out_dtype)


# ----------------------------- Fully-fused self-attention kernel ---------------------
def _mha_self_kernel(x_ref, wqkv_ref, bqkv_ref, wo_ref, bo_ref, m_ref, o_ref,
                     acc_ref, *, heads, head_dim, neg_fill):
    # x: (1, L, E) f32; wqkv: (E, 3E) bf16 = [Wq|Wk|Wv]; bqkv: (1, 3E) f32;
    # wo: (E, E) bf16; bo: (1, E) f32; mask: (1, 1, L, L) int8; o: (1, L, E) f32.
    E = heads * head_dim
    x = x_ref[0].astype(jnp.bfloat16)                     # single x read per batch item
    qkv = (jnp.dot(x, wqkv_ref[...], preferred_element_type=jnp.float32)
           + bqkv_ref[...]).astype(jnp.bfloat16)          # (L, 3E)
    q = qkv[:, 0 * E:1 * E]
    k = qkv[:, 1 * E:2 * E]
    v = qkv[:, 2 * E:3 * E]
    mask0 = m_ref[0, 0].astype(jnp.int32) == 0            # shared across heads
    o_ref[0] = _attend_and_project(q, k, v, mask0, wo_ref[...], bo_ref[...],
                                   acc_ref, heads=heads, head_dim=head_dim,
                                   neg_fill=neg_fill, out_dtype=o_ref.dtype)


def mha_self(x, wqkv_bf16, bqkv_f32, wo_bf16, bo_f32, mask_i8, heads):
    """x: (N, L, E) f32 -> (N, L, E) f32. Whole SelfAttention module in one kernel."""
    # TODO(synk): add flash-style online-softmax Lq/Lk tiling for long sequences
    # (needed on v7x's 64 MiB VMEM when L is large); toy L here fits fully resident.
    N, L, E = x.shape
    D = E // heads
    neg_fill = float(-1e9 / (float(E) ** 0.5))  # matches masked_fill(-1e9) then /sqrt(E)
    kernel = functools.partial(_mha_self_kernel, heads=heads, head_dim=D,
                               neg_fill=neg_fill)
    return pl.pallas_call(
        kernel,
        out_shape=jax.ShapeDtypeStruct((N, L, E), jnp.float32),
        grid=(N,),
        in_specs=[
            pl.BlockSpec((1, L, E), lambda n: (n, 0, 0)),
            pl.BlockSpec((E, 3 * E), lambda n: (0, 0)),        # resident across grid
            pl.BlockSpec((1, 3 * E), lambda n: (0, 0)),
            pl.BlockSpec((E, E), lambda n: (0, 0)),
            pl.BlockSpec((1, E), lambda n: (0, 0)),
            pl.BlockSpec((1, 1, L, L), lambda n: (n, 0, 0, 0)),  # no head broadcast
        ],
        out_specs=pl.BlockSpec((1, L, E), lambda n: (n, 0, 0)),
        scratch_shapes=[pltpu.VMEM((L, E), jnp.float32)],
        compiler_params=pltpu.CompilerParams(
            dimension_semantics=("parallel",),
            vmem_limit_bytes=_VMEM_LIMIT_BYTES),
    )(x, wqkv_bf16, bqkv_f32.reshape(1, 3 * E), wo_bf16, bo_f32.reshape(1, E),
      mask_i8)


# ----------------------------- Fully-fused cross-attention kernel --------------------
def _mha_cross_kernel(xq_ref, xk_ref, xv_ref, wq_ref, bq_ref, wk_ref, bk_ref,
                      wv_ref, bv_ref, wo_ref, bo_ref, m_ref, o_ref, acc_ref, *,
                      heads, head_dim, neg_fill):
    def proj(x_ref, w_ref, b_ref):
        x = x_ref[0].astype(jnp.bfloat16)
        return (jnp.dot(x, w_ref[...], preferred_element_type=jnp.float32)
                + b_ref[...]).astype(jnp.bfloat16)

    q = proj(xq_ref, wq_ref, bq_ref)                      # (Lq, E)
    k = proj(xk_ref, wk_ref, bk_ref)                      # (Lk, E)
    v = proj(xv_ref, wv_ref, bv_ref)                      # (Lk, E)
    mask0 = m_ref[0, 0].astype(jnp.int32) == 0
    o_ref[0] = _attend_and_project(q, k, v, mask0, wo_ref[...], bo_ref[...],
                                   acc_ref, heads=heads, head_dim=head_dim,
                                   neg_fill=neg_fill, out_dtype=o_ref.dtype)


def mha_cross(query, keys, values, params, mask_i8, heads):
    """Distinct q/k/v inputs. query: (N, Lq, E), keys/values: (N, Lk, E) f32."""
    N, Lq, E = query.shape
    Lk = keys.shape[1]
    D = E // heads
    neg_fill = float(-1e9 / (float(E) ** 0.5))
    kernel = functools.partial(_mha_cross_kernel, heads=heads, head_dim=D,
                               neg_fill=neg_fill)
    kv_spec = pl.BlockSpec((1, Lk, E), lambda n: (n, 0, 0))
    w_spec = pl.BlockSpec((E, E), lambda n: (0, 0))
    b_spec = pl.BlockSpec((1, E), lambda n: (0, 0))
    return pl.pallas_call(
        kernel,
        out_shape=jax.ShapeDtypeStruct((N, Lq, E), jnp.float32),
        grid=(N,),
        in_specs=[
            pl.BlockSpec((1, Lq, E), lambda n: (n, 0, 0)),      # query
            kv_spec,                                            # keys
            kv_spec,                                            # values
            w_spec, b_spec,                                     # Wq (pre-scaled), bq
            w_spec, b_spec,                                     # Wk, bk
            w_spec, b_spec,                                     # Wv, bv
            w_spec, b_spec,                                     # Wo, bo
            pl.BlockSpec((1, 1, Lq, Lk), lambda n: (n, 0, 0, 0)),
        ],
        out_specs=pl.BlockSpec((1, Lq, E), lambda n: (n, 0, 0)),
        scratch_shapes=[pltpu.VMEM((Lq, E), jnp.float32)],
        compiler_params=pltpu.CompilerParams(
            dimension_semantics=("parallel",),
            vmem_limit_bytes=_VMEM_LIMIT_BYTES),
    )(query, keys, values,
      params["Wq"], params["bq"].reshape(1, E),
      params["Wk"], params["bk"].reshape(1, E),
      params["Wv"], params["bv"].reshape(1, E),
      params["Wo"], params["bo"].reshape(1, E),
      mask_i8)


# ----------------------------- Parameter preparation ---------------------------------
def prepare_params(raw, embed_size):
    """From PyTorch-layout weights (E_out, E_in) / biases (E_out,):
    pre-transpose to (E_in, E_out), cast weights to bf16, fold 1/sqrt(E) into the Q
    projection, and build the fused [Wq|Wk|Wv] matrix for the self-attention fast path."""
    scale = 1.0 / (float(embed_size) ** 0.5)

    def t(w):
        return jnp.asarray(w.T, jnp.bfloat16)

    p = {
        "Wq": t(raw["Wq"] * scale), "bq": (raw["bq"] * scale).astype(jnp.float32),
        "Wk": t(raw["Wk"]),         "bk": raw["bk"].astype(jnp.float32),
        "Wv": t(raw["Wv"]),         "bv": raw["bv"].astype(jnp.float32),
        "Wo": t(raw["Wo"]),         "bo": raw["bo"].astype(jnp.float32),
    }
    p["Wqkv"] = jnp.concatenate([p["Wq"], p["Wk"], p["Wv"]], axis=1)  # (E, 3E) bf16
    p["bqkv"] = jnp.concatenate([p["bq"], p["bk"], p["bv"]])          # (3E,) f32
    return p


# ----------------------------- Module forward (glue + kernels) -----------------------
def self_attention_forward(params, values, keys, query, mask, heads):
    N, Lv, E = values.shape
    Lk = keys.shape[1]
    Lq = query.shape[1]
    assert Lv == Lk, "attention requires key_len == value_len"

    if mask is None:
        mask_i8 = jnp.ones((N, 1, Lq, Lk), jnp.int8)
    else:
        # Keep the head-unbroadcast (N, 1, Lq, Lk) mask; int8 cuts mask traffic 4x.
        mask_i8 = jnp.broadcast_to(mask, (N, 1, Lq, Lk)).astype(jnp.int8)

    if values is keys and keys is query:
        # True self-attention: single fully-fused kernel (one x read, one QKV matmul).
        return mha_self(query, params["Wqkv"], params["bqkv"],
                        params["Wo"], params["bo"], mask_i8, heads)
    # Cross-attention style call: fused kernel with separate projections.
    return mha_cross(query, keys, values, params, mask_i8, heads)


# ----------------------------- Pure-JAX reference (f32, PyTorch semantics) -----------
def self_attention_reference(raw, values, keys, query, mask, heads):
    N, Lv, E = values.shape
    Lq = query.shape[1]
    D = E // heads
    v = (values.reshape(-1, E) @ raw["Wv"].T + raw["bv"]).reshape(N, Lv, heads, D)
    k = (keys.reshape(-1, E) @ raw["Wk"].T + raw["bk"]).reshape(N, -1, heads, D)
    q = (query.reshape(-1, E) @ raw["Wq"].T + raw["bq"]).reshape(N, Lq, heads, D)
    energy = jnp.einsum('nqhd,nkhd->nhqk', q, k)
    if mask is not None:
        energy = jnp.where(mask == 0, -1e9, energy)
    att = jax.nn.softmax(energy / (E ** 0.5), axis=3)
    out = jnp.einsum('nhql,nlhd->nqhd', att, v).reshape(N, Lq, E)
    return (out.reshape(-1, E) @ raw["Wo"].T + raw["bo"]).reshape(N, Lq, E)


if __name__ == "__main__":
    embed_size = 32
    heads = 4
    N = 2
    L = 8

    root = jax.random.PRNGKey(0)
    ks = jax.random.split(root, 12)

    def init_lin(kw, kb):
        w = 0.05 * jax.random.normal(kw, (embed_size, embed_size), jnp.float32)
        b = 0.05 * jax.random.normal(kb, (embed_size,), jnp.float32)
        return w, b

    Wv, bv = init_lin(ks[0], ks[1])
    Wk, bk = init_lin(ks[2], ks[3])
    Wq, bq = init_lin(ks[4], ks[5])
    Wo, bo = init_lin(ks[6], ks[7])
    raw = dict(Wv=Wv, bv=bv, Wk=Wk, bk=bk, Wq=Wq, bq=bq, Wo=Wo, bo=bo)
    params = prepare_params(raw, embed_size)

    # causal mask, (N, 1, Lq, Lk) — broadcast over heads like the PyTorch masked_fill
    mask = jnp.broadcast_to(jnp.tril(jnp.ones((L, L), jnp.int32))[None, None],
                            (N, 1, L, L))

    # 1) True self-attention (values = keys = query): fully-fused fast path.
    x = jax.random.normal(ks[8], (N, L, embed_size), jnp.float32)
    out1 = jax.block_until_ready(self_attention_forward(params, x, x, x, mask, heads))
    ref1 = self_attention_reference(raw, x, x, x, mask, heads)
    assert out1.shape == (N, L, embed_size)
    assert jnp.allclose(out1, ref1, atol=1e-2, rtol=1e-2), \
        float(jnp.max(jnp.abs(out1 - ref1)))

    # 2) Distinct values / keys / query: fused cross-attention path.
    values = jax.random.normal(ks[9], (N, L, embed_size), jnp.float32)
    keys_in = jax.random.normal(ks[10], (N, L, embed_size), jnp.float32)
    query = jax.random.normal(ks[11], (N, L, embed_size), jnp.float32)
    out2 = jax.block_until_ready(
        self_attention_forward(params, values, keys_in, query, mask, heads))
    ref2 = self_attention_reference(raw, values, keys_in, query, mask, heads)
    assert out2.shape == (N, L, embed_size)
    assert jnp.allclose(out2, ref2, atol=1e-2, rtol=1e-2), \
        float(jnp.max(jnp.abs(out2 - ref2)))

    print("KERNEL_OK")
</pallas_src>

<mosaic_0001>
module attributes {stable_mosaic.version = 11 : i64} {
  func.func @_mha_self_kernel(%arg0: i32, %arg1: memref<1x8x32xf32, #tpu.memory_space<vmem>>, %arg2: memref<32x96xbf16, #tpu.memory_space<vmem>>, %arg3: memref<1x96xf32, #tpu.memory_space<vmem>>, %arg4: memref<32x32xbf16, #tpu.memory_space<vmem>>, %arg5: memref<1x32xf32, #tpu.memory_space<vmem>>, %arg6: memref<1x1x8x8xi8, #tpu.memory_space<vmem>>, %arg7: memref<1x8x32xf32, #tpu.memory_space<vmem>>, %arg8: memref<8x32xf32, #tpu.memory_space<vmem>>) attributes {dimension_semantics = [#tpu.dimension_semantics<parallel>], iteration_bounds = array<i64: 2>, scalar_prefetch = 0 : i64, scratch_operands = 1 : i64, tpu.core_type = #tpu.core_type<tc>, window_params = [{transform_indices = @transform_0, window_bounds = array<i64: 1, 8, 32>}, {pipeline_mode = #tpu.pipeline_mode<synchronous>, transform_indices = @transform_1, window_bounds = array<i64: 32, 96>}, {pipeline_mode = #tpu.pipeline_mode<synchronous>, transform_indices = @transform_2, window_bounds = array<i64: 1, 96>}, {pipeline_mode = #tpu.pipeline_mode<synchronous>, transform_indices = @transform_3, window_bounds = array<i64: 32, 32>}, {pipeline_mode = #tpu.pipeline_mode<synchronous>, transform_indices = @transform_4, window_bounds = array<i64: 1, 32>}, {transform_indices = @transform_5, window_bounds = array<i64: 1, 1, 8, 8>}, {transform_indices = @transform_6, window_bounds = array<i64: 1, 8, 32>}]} {
    %c0 = arith.constant 0 : index
    %c0_0 = arith.constant 0 : index
    %c0_1 = arith.constant 0 : index
    %0 = vector.load %arg1[%c0, %c0_0, %c0_1] : memref<1x8x32xf32, #tpu.memory_space<vmem>>, vector<1x8x32xf32>
    %1 = vector.shape_cast %0 : vector<1x8x32xf32> to vector<8x32xf32>
    %2 = arith.truncf %1 : vector<8x32xf32> to vector<8x32xbf16>
    %c0_2 = arith.constant 0 : index
    %c0_3 = arith.constant 0 : index
    %3 = vector.load %arg2[%c0_2, %c0_3] : memref<32x96xbf16, #tpu.memory_space<vmem>>, vector<32x96xbf16>
    %cst = arith.constant dense<0.000000e+00> : vector<8x96xf32>
    %4 = tpu.matmul %2, %3, %cst {dimension_numbers = #tpu.dot_dimension_numbers<[1], [0], [0], [1], [0, 0, 1, 1], [], []>} : vector<8x32xbf16>, vector<32x96xbf16>, vector<8x96xf32> -> vector<8x96xf32>
    %c0_4 = arith.constant 0 : index
    %c0_5 = arith.constant 0 : index
    %5 = vector.load %arg3[%c0_4, %c0_5] : memref<1x96xf32, #tpu.memory_space<vmem>>, vector<1x96xf32>
    %6 = vector.broadcast %5 : vector<1x96xf32> to vector<8x96xf32>
    %7 = arith.addf %4, %6 : vector<8x96xf32>
    %8 = arith.truncf %7 : vector<8x96xf32> to vector<8x96xbf16>
    %9 = vector.extract_strided_slice %8 {offsets = [0, 0], sizes = [8, 32], strides = [1, 1]} : vector<8x96xbf16> to vector<8x32xbf16>
    %10 = vector.extract_strided_slice %8 {offsets = [0, 32], sizes = [8, 32], strides = [1, 1]} : vector<8x96xbf16> to vector<8x32xbf16>
    %11 = vector.extract_strided_slice %8 {offsets = [0, 64], sizes = [8, 32], strides = [1, 1]} : vector<8x96xbf16> to vector<8x32xbf16>
    %c0_6 = arith.constant 0 : index
    %c0_7 = arith.constant 0 : index
    %c0_8 = arith.constant 0 : index
    %c0_9 = arith.constant 0 : index
    %12 = vector.load %arg6[%c0_6, %c0_7, %c0_8, %c0_9] : memref<1x1x8x8xi8, #tpu.memory_space<vmem>>, vector<1x1x8x8xi8>
    %13 = vector.shape_cast %12 : vector<1x1x8x8xi8> to vector<8x8xi8>
    %14 = arith.extsi %13 : vector<8x8xi8> to vector<8x8xi32>
    %c0_i32 = arith.constant 0 : i32
    %15 = vector.broadcast %c0_i32 : i32 to vector<8x8xi32>
    %16 = arith.cmpi eq, %14, %15 : vector<8x8xi32>
    %c0_10 = arith.constant 0 : index
    %c0_11 = arith.constant 0 : index
    %17 = vector.load %arg4[%c0_10, %c0_11] : memref<32x32xbf16, #tpu.memory_space<vmem>>, vector<32x32xbf16>
    %c0_12 = arith.constant 0 : index
    %c0_13 = arith.constant 0 : index
    %18 = vector.load %arg5[%c0_12, %c0_13] : memref<1x32xf32, #tpu.memory_space<vmem>>, vector<1x32xf32>
    %19 = vector.extract_strided_slice %9 {offsets = [0, 0], sizes = [8, 8], strides = [1, 1]} : vector<8x32xbf16> to vector<8x8xbf16>
    %20 = vector.extract_strided_slice %10 {offsets = [0, 0], sizes = [8, 8], strides = [1, 1]} : vector<8x32xbf16> to vector<8x8xbf16>
    %21 = vector.extract_strided_slice %11 {offsets = [0, 0], sizes = [8, 8], strides = [1, 1]} : vector<8x32xbf16> to vector<8x8xbf16>
    %cst_14 = arith.constant dense<0.000000e+00> : vector<8x8xf32>
    %22 = tpu.matmul %19, %20, %cst_14 {dimension_numbers = #tpu.dot_dimension_numbers<[1], [1], [0], [0], [0, 0, 1, 0], [], []>} : vector<8x8xbf16>, vector<8x8xbf16>, vector<8x8xf32> -> vector<8x8xf32>
    %cst_15 = arith.constant 0xCD28965F : f32
    %23 = vector.broadcast %cst_15 : f32 to vector<8x8xf32>
    %24 = arith.select %16, %23, %22 : vector<8x8xi1>, vector<8x8xf32>
    %cst_16 = arith.constant dense<0xFF800000> : vector<8xf32>
    %25 = vector.multi_reduction <maximumf>, %24, %cst_16 [1] : vector<8x8xf32> to vector<8xf32>
    %26 = vector.shape_cast %25 : vector<8xf32> to vector<8x1xf32>
    %27 = vector.broadcast %26 : vector<8x1xf32> to vector<8x8xf32>
    %28 = arith.subf %24, %27 : vector<8x8xf32>
    %29 = math.exp %28 : vector<8x8xf32>
    %cst_17 = arith.constant dense<0.000000e+00> : vector<8xf32>
    %30 = vector.multi_reduction <add>, %29, %cst_17 [1] : vector<8x8xf32> to vector<8xf32>
    %31 = vector.shape_cast %30 : vector<8xf32> to vector<8x1xf32>
    %32 = tpu.reciprocal %31 {approx = true} : vector<8x1xf32> -> vector<8x1xf32>
    %33 = vector.broadcast %32 : vector<8x1xf32> to vector<8x8xf32>
    %34 = arith.mulf %29, %33 : vector<8x8xf32>
    %35 = arith.truncf %34 : vector<8x8xf32> to vector<8x8xbf16>
    %cst_18 = arith.constant dense<0.000000e+00> : vector<8x8xf32>
    %36 = tpu.matmul %35, %21, %cst_18 {dimension_numbers = #tpu.dot_dimension_numbers<[1], [0], [0], [1], [0, 0, 1, 1], [], []>} : vector<8x8xbf16>, vector<8x8xbf16>, vector<8x8xf32> -> vector<8x8xf32>
    %c0_19 = arith.constant 0 : index
    %c0_20 = arith.constant 0 : index
    %37 = vector.load %arg8[%c0_19, %c0_20] : memref<8x32xf32, #tpu.memory_space<vmem>>, vector<8x8xf32>
    tpu.vector_store %arg8[%c0_19, %c0_20], %36 {strides = array<i32>} : memref<8x32xf32, #tpu.memory_space<vmem>>, vector<8x8xf32>,
    %38 = vector.extract_strided_slice %9 {offsets = [0, 8], sizes = [8, 8], strides = [1, 1]} : vector<8x32xbf16> to vector<8x8xbf16>
    %39 = vector.extract_strided_slice %10 {offsets = [0, 8], sizes = [8, 8], strides = [1, 1]} : vector<8x32xbf16> to vector<8x8xbf16>
    %40 = vector.extract_strided_slice %11 {offsets = [0, 8], sizes = [8, 8], strides = [1, 1]} : vector<8x32xbf16> to vector<8x8xbf16>
    %cst_21 = arith.constant dense<0.000000e+00> : vector<8x8xf32>
    %41 = tpu.matmul %38, %39, %cst_21 {dimension_numbers = #tpu.dot_dimension_numbers<[1], [1], [0], [0], [0, 0, 1, 0], [], []>} : vector<8x8xbf16>, vector<8x8xbf16>, vector<8x8xf32> -> vector<8x8xf32>
    %cst_22 = arith.constant 0xCD28965F : f32
    %42 = vector.broadcast %cst_22 : f32 to vector<8x8xf32>
    %43 = arith.select %16, %42, %41 : vector<8x8xi1>, vector<8x8xf32>
    %cst_23 = arith.constant dense<0xFF800000> : vector<8xf32>
    %44 = vector.multi_reduction <maximumf>, %43, %cst_23 [1] : vector<8x8xf32> to vector<8xf32>
    %45 = vector.shape_cast %44 : vector<8xf32> to vector<8x1xf32>
    %46 = vector.broadcast %45 : vector<8x1xf32> to vector<8x8xf32>
    %47 = arith.subf %43, %46 : vector<8x8xf32>
    %48 = math.exp %47 : vector<8x8xf32>
    %cst_24 = arith.constant dense<0.000000e+00> : vector<8xf32>
    %49 = vector.multi_reduction <add>, %48, %cst_24 [1] : vector<8x8xf32> to vector<8xf32>
    %50 = vector.shape_cast %49 : vector<8xf32> to vector<8x1xf32>
    %51 = tpu.reciprocal %50 {approx = true} : vector<8x1xf32> -> vector<8x1xf32>
    %52 = vector.broadcast %51 : vector<8x1xf32> to vector<8x8xf32>
    %53 = arith.mulf %48, %52 : vector<8x8xf32>
    %54 = arith.truncf %53 : vector<8x8xf32> to vector<8x8xbf16>
    %cst_25 = arith.constant dense<0.000000e+00> : vector<8x8xf32>
    %55 = tpu.matmul %54, %40, %cst_25 {dimension_numbers = #tpu.dot_dimension_numbers<[1], [0], [0], [1], [0, 0, 1, 1], [], []>} : vector<8x8xbf16>, vector<8x8xbf16>, vector<8x8xf32> -> vector<8x8xf32>
    %c0_26 = arith.constant 0 : index
    %c8 = arith.constant 8 : index
    %56 = vector.load %arg8[%c0_26, %c8] : memref<8x32xf32, #tpu.memory_space<vmem>>, vector<8x8xf32>
    tpu.vector_store %arg8[%c0_26, %c8], %55 {strides = array<i32>} : memref<8x32xf32, #tpu.memory_space<vmem>>, vector<8x8xf32>,
    %57 = vector.extract_strided_slice %9 {offsets = [0, 16], sizes = [8, 8], strides = [1, 1]} : vector<8x32xbf16> to vector<8x8xbf16>
    %58 = vector.extract_strided_slice %10 {offsets = [0, 16], sizes = [8, 8], strides = [1, 1]} : vector<8x32xbf16> to vector<8x8xbf16>
    %59 = vector.extract_strided_slice %11 {offsets = [0, 16], sizes = [8, 8], strides = [1, 1]} : vector<8x32xbf16> to vector<8x8xbf16>
    %cst_27 = arith.constant dense<0.000000e+00> : vector<8x8xf32>
    %60 = tpu.matmul %57, %58, %cst_27 {dimension_numbers = #tpu.dot_dimension_numbers<[1], [1], [0], [0], [0, 0, 1, 0], [], []>} : vector<8x8xbf16>, vector<8x8xbf16>, vector<8x8xf32> -> vector<8x8xf32>
    %cst_28 = arith.constant 0xCD28965F : f32
    %61 = vector.broadcast %cst_28 : f32 to vector<8x8xf32>
    %62 = arith.select %16, %61, %60 : vector<8x8xi1>, vector<8x8xf32>
    %cst_29 = arith.constant dense<0xFF800000> : vector<8xf32>
    %63 = vector.multi_reduction <maximumf>, %62, %cst_29 [1] : vector<8x8xf32> to vector<8xf32>
    %64 = vector.shape_cast %63 : vector<8xf32> to vector<8x1xf32>
    %65 = vector.broadcast %64 : vector<8x1xf32> to vector<8x8xf32>
    %66 = arith.subf %62, %65 : vector<8x8xf32>
    %67 = math.exp %66 : vector<8x8xf32>
    %cst_30 = arith.constant dense<0.000000e+00> : vector<8xf32>
    %68 = vector.multi_reduction <add>, %67, %cst_30 [1] : vector<8x8xf32> to vector<8xf32>
    %69 = vector.shape_cast %68 : vector<8xf32> to vector<8x1xf32>
    %70 = tpu.reciprocal %69 {approx = true} : vector<8x1xf32> -> vector<8x1xf32>
    %71 = vector.broadcast %70 : vector<8x1xf32> to vector<8x8xf32>
    %72 = arith.mulf %67, %71 : vector<8x8xf32>
    %73 = arith.truncf %72 : vector<8x8xf32> to vector<8x8xbf16>
    %cst_31 = arith.constant dense<0.000000e+00> : vector<8x8xf32>
    %74 = tpu.matmul %73, %59, %cst_31 {dimension_numbers = #tpu.dot_dimension_numbers<[1], [0], [0], [1], [0, 0, 1, 1], [], []>} : vector<8x8xbf16>, vector<8x8xbf16>, vector<8x8xf32> -> vector<8x8xf32>
    %c0_32 = arith.constant 0 : index
    %c16 = arith.constant 16 : index
    %75 = vector.load %arg8[%c0_32, %c16] : memref<8x32xf32, #tpu.memory_space<vmem>>, vector<8x8xf32>
    tpu.vector_store %arg8[%c0_32, %c16], %74 {strides = array<i32>} : memref<8x32xf32, #tpu.memory_space<vmem>>, vector<8x8xf32>,
    %76 = vector.extract_strided_slice %9 {offsets = [0, 24], sizes = [8, 8], strides = [1, 1]} : vector<8x32xbf16> to vector<8x8xbf16>
    %77 = vector.extract_strided_slice %10 {offsets = [0, 24], sizes = [8, 8], strides = [1, 1]} : vector<8x32xbf16> to vector<8x8xbf16>
    %78 = vector.extract_strided_slice %11 {offsets = [0, 24], sizes = [8, 8], strides = [1, 1]} : vector<8x32xbf16> to vector<8x8xbf16>
    %cst_33 = arith.constant dense<0.000000e+00> : vector<8x8xf32>
    %79 = tpu.matmul %76, %77, %cst_33 {dimension_numbers = #tpu.dot_dimension_numbers<[1], [1], [0], [0], [0, 0, 1, 0], [], []>} : vector<8x8xbf16>, vector<8x8xbf16>, vector<8x8xf32> -> vector<8x8xf32>
    %cst_34 = arith.constant 0xCD28965F : f32
    %80 = vector.broadcast %cst_34 : f32 to vector<8x8xf32>
    %81 = arith.select %16, %80, %79 : vector<8x8xi1>, vector<8x8xf32>
    %cst_35 = arith.constant dense<0xFF800000> : vector<8xf32>
    %82 = vector.multi_reduction <maximumf>, %81, %cst_35 [1] : vector<8x8xf32> to vector<8xf32>
    %83 = vector.shape_cast %82 : vector<8xf32> to vector<8x1xf32>
    %84 = vector.broadcast %83 : vector<8x1xf32> to vector<8x8xf32>
    %85 = arith.subf %81, %84 : vector<8x8xf32>
    %86 = math.exp %85 : vector<8x8xf32>
    %cst_36 = arith.constant dense<0.000000e+00> : vector<8xf32>
    %87 = vector.multi_reduction <add>, %86, %cst_36 [1] : vector<8x8xf32> to vector<8xf32>
    %88 = vector.shape_cast %87 : vector<8xf32> to vector<8x1xf32>
    %89 = tpu.reciprocal %88 {approx = true} : vector<8x1xf32> -> vector<8x1xf32>
    %90 = vector.broadcast %89 : vector<8x1xf32> to vector<8x8xf32>
    %91 = arith.mulf %86, %90 : vector<8x8xf32>
    %92 = arith.truncf %91 : vector<8x8xf32> to vector<8x8xbf16>
    %cst_37 = arith.constant dense<0.000000e+00> : vector<8x8xf32>
    %93 = tpu.matmul %92, %78, %cst_37 {dimension_numbers = #tpu.dot_dimension_numbers<[1], [0], [0], [1], [0, 0, 1, 1], [], []>} : vector<8x8xbf16>, vector<8x8xbf16>, vector<8x8xf32> -> vector<8x8xf32>
    %c0_38 = arith.constant 0 : index
    %c24 = arith.constant 24 : index
    %94 = vector.load %arg8[%c0_38, %c24] : memref<8x32xf32, #tpu.memory_space<vmem>>, vector<8x8xf32>
    tpu.vector_store %arg8[%c0_38, %c24], %93 {strides = array<i32>} : memref<8x32xf32, #tpu.memory_space<vmem>>, vector<8x8xf32>,
    %c0_39 = arith.constant 0 : index
    %c0_40 = arith.constant 0 : index
    %95 = vector.load %arg8[%c0_39, %c0_40] : memref<8x32xf32, #tpu.memory_space<vmem>>, vector<8x32xf32>
    %96 = arith.truncf %95 : vector<8x32xf32> to vector<8x32xbf16>
    %cst_41 = arith.constant dense<0.000000e+00> : vector<8x32xf32>
    %97 = tpu.matmul %96, %17, %cst_41 {dimension_numbers = #tpu.dot_dimension_numbers<[1], [0], [0], [1], [0, 0, 1, 1], [], []>} : vector<8x32xbf16>, vector<32x32xbf16>, vector<8x32xf32> -> vector<8x32xf32>
    %98 = vector.broadcast %18 : vector<1x32xf32> to vector<8x32xf32>
    %99 = arith.addf %97, %98 : vector<8x32xf32>
    %c0_42 = arith.constant 0 : index
    %c0_43 = arith.constant 0 : index
    %c0_44 = arith.constant 0 : index
    %100 = vector.load %arg7[%c0_42, %c0_43, %c0_44] : memref<1x8x32xf32, #tpu.memory_space<vmem>>, vector<1x8x32xf32>
    %101 = vector.shape_cast %100 : vector<1x8x32xf32> to vector<8x32xf32>
    %102 = vector.shape_cast %99 : vector<8x32xf32> to vector<1x8x32xf32>
    tpu.vector_store %arg7[%c0_42, %c0_43, %c0_44], %102 {strides = array<i32>} : memref<1x8x32xf32, #tpu.memory_space<vmem>>, vector<1x8x32xf32>,
    return
  }
  func.func @transform_0(%arg0: i32) -> (i32, i32, i32) {
    %c0_i32 = arith.constant 0 : i32
    %c0_i32_0 = arith.constant 0 : i32
    %c0_i32_1 = arith.constant 0 : i32
    return %arg0, %c0_i32, %c0_i32_0 : i32, i32, i32
  }
  func.func @transform_1(%arg0: i32) -> (i32, i32) {
    %c0_i32 = arith.constant 0 : i32
    %c0_i32_0 = arith.constant 0 : i32
    %c0_i32_1 = arith.constant 0 : i32
    return %c0_i32, %c0_i32_0 : i32, i32
  }
  func.func @transform_2(%arg0: i32) -> (i32, i32) {
    %c0_i32 = arith.constant 0 : i32
    %c0_i32_0 = arith.constant 0 : i32
    %c0_i32_1 = arith.constant 0 : i32
    return %c0_i32, %c0_i32_0 : i32, i32
  }
  func.func @transform_3(%arg0: i32) -> (i32, i32) {
    %c0_i32 = arith.constant 0 : i32
    %c0_i32_0 = arith.constant 0 : i32
    %c0_i32_1 = arith.constant 0 : i32
    return %c0_i32, %c0_i32_0 : i32, i32
  }
  func.func @transform_4(%arg0: i32) -> (i32, i32) {
    %c0_i32 = arith.constant 0 : i32
    %c0_i32_0 = arith.constant 0 : i32
    %c0_i32_1 = arith.constant 0 : i32
    return %c0_i32, %c0_i32_0 : i32, i32
  }
  func.func @transform_5(%arg0: i32) -> (i32, i32, i32, i32) {
    %c0_i32 = arith.constant 0 : i32
    %c0_i32_0 = arith.constant 0 : i32
    %c0_i32_1 = arith.constant 0 : i32
    %c0_i32_2 = arith.constant 0 : i32
    return %arg0, %c0_i32, %c0_i32_0, %c0_i32_1 : i32, i32, i32, i32
  }
  func.func @transform_6(%arg0: i32) -> (i32, i32, i32) {
    %c0_i32 = arith.constant 0 : i32
    %c0_i32_0 = arith.constant 0 : i32
    %c0_i32_1 = arith.constant 0 : i32
    return %arg0, %c0_i32, %c0_i32_0 : i32, i32, i32
  }
}

</mosaic_0001>

<bundles_post_ra>
// kernel: tpu_custom_call.1
= control target key start
LH: loop header
LB: loop body
LE: loop exit
PB: predicated region body
PF: predicated region fallthrough
CT: control target
= control target key end

     0   :  { %11 = vsyncpa [#allocation4], 0  ;;  %s1804_s0 = inlined_call_operand.hbm [shape: f32[2,8,32], index: 0, kind: input, shape index: {}]   ;;  %s1805_s1 = inlined_call_operand.hbm [shape: bf16[32,96], index: 1, kind: input, shape index: {}]   ;;  %s1806_s2 = inlined_call_operand.vmem [shape: f32[1,96], index: 2, kind: input, shape index: {}]   ;;  %s1807_s3 = inlined_call_operand.hbm [shape: bf16[32,32], index: 3, kind: input, shape index: {}]   ;;  %s1808_s4 = inlined_call_operand.vmem [shape: f32[1,32], index: 4, kind: input, shape index: {}]   ;;  %s1809_s5 = inlined_call_operand.vmem [shape: s8[2,1,8,8], index: 5, kind: input, shape index: {}]   ;;  %s1810_s6 = inlined_call_operand.hbm [shape: f32[2,8,32], index: 6, kind: output, shape index: {}]  }
   0x1   :  { %13 = vsyncpa [#allocation4 + $0x1], 0 }
   0x2   :  { %14 = vsyncpa [#allocation7], 0 }
   0x3   :  { %15 = vsyncpa [#allocation5], 0 }
   0x4   :  { %17 = vsyncpa [#allocation5 + $0x1], 0  ;;  %s1474_s21 = smov 0   ;;  %s1476_s22 = smov 0  }
   0x5   :  { %s1478_s23 = smov 0   ;;  %s1480_s24 = smov 0  }
   0x6 LB: > { %s1495_s25 = sadd.s32 4294967295, %s1415_s24   ;;  %s1035_s26 = sadd.s32 4294967294, %s1415_s24   ;;  %s1415_s24 = sphi %s1480_s24, %s1832_s24   ;;  %s1411_s23 = sphi %s1478_s23, %s1831_s23   ;;  %s1407_s22 = sphi %s1476_s22, %s1830_s22   ;;  %s1403_s21 = sphi %s1474_s21, %s1829_s21  }
   0x7   : > { %p43_p0 = scmp.ne.s32.totalorder %s1407_s22, %s1403_s21  ;;  %p1811_p1 = scmp.eq.s32.totalorder %s1495_s25, 0 }
   0x8   : > { %p183_p3 = scmp.eq.s32.totalorder %s1035_s26, 1  ;;  %p1036_p5 = scmp.ge.s32.totalorder %s1415_s24, 1 }
   0x9   : > { %p1504_p4 = por %p1811_p1, %p43_p0  ;;  %p190_p7 = scmp.lt.s32.totalorder %s1415_s24, 3 }
   0xa   : > { %p1509_p6 = por %p183_p3, %p43_p0  ;;  %s1417_s30 = smov [#allocation6]  }
   0xb   : > { %s1814_s27 = scalar_select %p1504_p4, 1, 0 }
   0xc   : > { %s1815_s28 = scalar_select %p1509_p6, 1, 0 }
   0xd   : > { %p1514_p8 = pnand %p1036_p5, %p190_p7  ;;  %s202_s7 = sshll.u32 %s1417_s30, 4  ;;  %s1518_s7 = int_to_ptr.vmem [resolvable:$true] %s202_s7 }
   0xe   : > { %s1418_s9 = smov [#allocation8]   ;;  %s1259_s13 = scalar_lea.hbm %s1805_s1, 256 }
   0xf   : > { %p1166_p9 = pneg %p1514_p8  ;;  %s218_s10 = sshll.u32 %s1418_s9, 4  ;;  %s1529_s10 = int_to_ptr.vmem [resolvable:$true] %s218_s10 }
  0x10   : > { %p1260_p12 = scmp.ne.s32.totalorder %s1805_s1, %s1259_s13  ;;  %p1266_p5 = scmp.lt.u32.totalorder %s1259_s13, %s1805_s1 }
  0x11   : > { %p1525_p11 = pnand %p1166_p9, %p1811_p1 }
  0x13   : > { %p1261_p13 = pneg %p1525_p11 }
  0x15   : > { %p1262_p0 = pnand %p1261_p13, %p1260_p12 }
  0x17   : > { %p1263_p3 = pneg %p1262_p0 }
  0x19   : > { %p1268_p7 = pnand %p1266_p5, %p1263_p3 }
  0x1b   : > { %1271 = shalt.err (!%p1268_p7)
}
  0x1c   : > { %s1272_s18 = scalar_lea.vmem %s1518_s7, 256  ;;  %p1280_p2 = scmp.lt.s32.totalorder %s1518_s7, %s1518_s7 }
  0x1d   : > { %p1273_p9 = scmp.ne.s32.totalorder %s1518_s7, %s1272_s18  ;;  %p1281_p12 = scmp.lt.s32.totalorder %s1272_s18, %s1272_s18 }
  0x1f   : > { %p1275_p10 = pnand %p1273_p9, %p1261_p13  ;;  %p1282_p0 = por %p1281_p12, %p1280_p2 }
  0x21   : > { %p1276_p1 = pneg %p1275_p10 }
  0x23   : > { %p1283_p6 = pnand %p1282_p0, %p1276_p1 }
  0x25   : > { %1286 = shalt.err (!%p1283_p6)
}
  0x26   : > { %s1419_s19 = smov 64   ;;  %s1420_s20 = smov 4  }
  0x27   : > { %1169 = dma.hbm_to_vmem [thread:$0]  (!%p1525_p11), %s1805_s1, 256, %s1518_s7, [#allocation7], %s1419_s19, %s1419_s19, %s1420_s20  }
  0x28   : > { %s1287_s12 = scalar_lea.hbm %s1807_s3, 256 }
  0x29   : > { %p1288_p2 = scmp.ne.s32.totalorder %s1807_s3, %s1287_s12  ;;  %p1294_p10 = scmp.lt.u32.totalorder %s1287_s12, %s1807_s3 }
  0x2b   : > { %p1290_p1 = pnand %p1288_p2, %p1261_p13 }
  0x2d   : > { %p1291_p6 = pneg %p1290_p1 }
  0x2f   : > { %p1296_p3 = pnand %p1294_p10, %p1291_p6 }
  0x31   : > { %1299 = shalt.err (!%p1296_p3)
}
  0x32   : > { %s1300_s7 = scalar_lea.vmem %s1529_s10, 256  ;;  %p1308_p12 = scmp.lt.s32.totalorder %s1529_s10, %s1529_s10 }
  0x33   : > { %p1301_p5 = scmp.ne.s32.totalorder %s1529_s10, %s1300_s7  ;;  %p1309_p0 = scmp.lt.s32.totalorder %s1300_s7, %s1300_s7 }
  0x35   : > { %p1303_p7 = pnand %p1301_p5, %p1261_p13  ;;  %p1310_p2 = por %p1309_p0, %p1308_p12 }
  0x37   : > { %p1304_p9 = pneg %p1303_p7 }
  0x39   : > { %p1311_p1 = pnand %p1310_p2, %p1304_p9 }
  0x3b   : > { %1314 = shalt.err (!%p1311_p1)
}
  0x3c   : > { %1172 = dma.hbm_to_vmem [thread:$0]  (!%p1525_p11), %s1807_s3, 256, %s1529_s10, [#allocation7], %s1419_s19, %s1419_s19, %s1420_s20  }
  0x3d   : > { %s1584_s26 = sadd.s32 1, %s1415_s24   ;;  %s30_s8 = sadd.s32 1, %s1411_s23 }
  0x3e   : > { %s27_s30 = ssub.s32 %s1415_s24, %s1584_s26  ;;  %p37_p13 = scmp.ne.s32.totalorder %s1411_s23, %s1407_s22 }
  0x3f   : > { %p28_p6 = scmp.eq.s32.totalorder %s27_s30, 0  ;;  %p38_p10 = scmp.eq.s32.totalorder %s1415_s24, 0 }
  0x40   : > { %p1818_p3 = scmp.eq.s32.totalorder %s1495_s25, 1  ;;  %p1183_p7 = scmp.lt.s32.totalorder %s1415_s24, 2 }
  0x41   : > { %s1600_s11 = scalar_select %p28_p6, %s1411_s23, %s30_s8  }
  0x42   : > { %p1594_p5 = por %p1818_p3, %p37_p13  ;;  %p39_p9 = por %p38_p10, %p37_p13 }
  0x43   : > { %s235_s12 = sand.u32 1, %s1411_s23   ;;  %s1041_s10 = sshll.u32 %s1415_s24, 7 }
  0x44   : > { %s1819_s9 = scalar_select %p1594_p5, 1, 0 }
  0x45   : > { %s1040_s13 = sshll.u32 %s235_s12, 3  ;;  %s1607_s14 = scalar_lea.hbm %s1804_s0, %s1041_s10 }
  0x46   : > { %s239_s15 = scalar_lea.vmem [#allocation3], %s1040_s13  ;;  %p1611_p11 = pnand %p1183_p7, %p39_p9 }
  0x47   : > { %s246_s16 = sshll.u32 %s239_s15, 4  ;;  %s236_s17 = scalar_lea.sflag [#allocation4], %s235_s12  ;;  %s1609_s16 = int_to_ptr.vmem [resolvable:$true] %s246_s16 }
  0x48   : > { %s1315_s18 = scalar_lea.hbm %s1607_s14, 128  ;;  %p1317_p0 = pneg %p1611_p11 }
  0x49   : > { %p1316_p12 = scmp.ne.s32.totalorder %s1607_s14, %s1315_s18  ;;  %s1320_s13 = scalar_lea.hbm %s1804_s0, 256 }
  0x4a   : > { %p1321_p13 = scmp.lt.u32.totalorder %s1607_s14, %s1804_s0  ;;  %p1322_p6 = scmp.lt.u32.totalorder %s1320_s13, %s1315_s18 }
  0x4b   : > { %p1318_p2 = pnand %p1317_p0, %p1316_p12  ;;  %p1324_p3 = scmp.lt.u32.totalorder %s1315_s18, %s1607_s14 }
  0x4c   : > { %p1323_p10 = por %p1322_p6, %p1321_p13 }
  0x4d   : > { %p1319_p1 = pneg %p1318_p2 }
  0x4e   : > { %p1325_p7 = por %p1324_p3, %p1323_p10 }
  0x50   : > { %p1326_p9 = pnand %p1325_p7, %p1319_p1 }
  0x52   : > { %1329 = shalt.err (!%p1326_p9)
}
  0x53   : > { %s1330_s12 = scalar_lea.vmem %s1609_s16, 128  ;;  %s1421_s20 = smov [#allocation3]  }
  0x54   : > { %p1331_p12 = scmp.ne.s32.totalorder %s1609_s16, %s1330_s12  ;;  %s1335_s15 = sshll.u32 %s1421_s20, 4  ;;  %s1336_s15 = int_to_ptr.vmem [resolvable:$false] %s1335_s15 }
  0x55   : > { %s1337_s8 = scalar_lea.vmem %s1336_s15, 256  ;;  %p1338_p4 = scmp.lt.s32.totalorder %s1609_s16, %s1336_s15 }
  0x56   : > { %p1333_p2 = pnand %p1331_p12, %p1317_p0  ;;  %p1339_p13 = scmp.lt.s32.totalorder %s1337_s8, %s1330_s12 }
  0x58   : > { %p1334_p5 = pneg %p1333_p2  ;;  %p1340_p6 = por %p1339_p13, %p1338_p4 }
  0x5a   : > { %p1341_p10 = pnand %p1340_p6, %p1334_p5 }
  0x5c   : > { %1344 = shalt.err (!%p1341_p10)
}
  0x5d   : > { %1176 = dma.hbm_to_vmem [thread:$0]  (!%p1611_p11), %s1607_s14, 128, %s1609_s16, %s236_s17  }
  0x5e   : > { %262 = sbr.rel (%p1514_p8) target bundleno = 1610 (0x64a), region = 44  ;;  %s1643_s18 = sand.u32 (!%p1514_p8), 1, %s1407_s22  }
  0x5f   : > { %s1043_s30 = sshll.u32 (!%p1514_p8), %s1643_s18, 3  ;;  %s265_s13 = scalar_lea.sflag (!%p1514_p8), [#allocation4], %s1643_s18 }
  0x60   : > { %s268_s10 = scalar_lea.vmem (!%p1514_p8), [#allocation3], %s1043_s30  ;;  %p1821_p4 = scmp.ne.s32.totalorder (!%p1514_p8), %s1814_s27, 0 }
  0x65   : > { %1390 = dma.done.wait (%p1821_p4), %s265_s13, 128  }
  0x66   : > { %1392 = vsyncadd (%p1821_p4), %s265_s13, 4294967168  ;;  %p1822_p5 = scmp.eq.s32.totalorder %s1495_s25, 0 }
  0x68   : > { %1394 = dma.done.wait (%p1822_p5), [#allocation7], 512   ;;  %p1823_p8 = pmov %p1822_p5 }
  0x69   : > { %v1422_v0 = vmov 0.0   ;;  %vm1423_vm0 = vmmov 0   ;;  %v1239_v1 = vld [vmem:[#allocation6] sm:$0xff]   ;;  %v1240_v2 = vld [vmem:[#allocation6 + $0x8] sm:$0xff]   ;;  %v314_v3 = vld [vmem:[%s268_s10] sm:$0xff]  ;;  %vm339_vm1 = vcmask 261120  }
  0x6a   : > { %1396 = vsyncadd (%p1823_p8), [#allocation7], 4294966784  ;;  %1090 = vmatprep.subr.bf16.mxu0 %v1422_v0  ;;  %1094 = vmatprep.mubr.msk.bf16.mxu0 %vm1423_vm0, %v1422_v0  ;;  %v315_v4 = vpack.c.bf16 %v314_v3, %v314_v3  ;;  %v1048_v5 = vld [vmem:[%s1806_s2] ss:$0 sm:$0xff]  ;;  %s1424_s14 = smov 120   ;;  %s1425_s16 = smov 96  }
  0x6b   : > { %1098 = vmatprep.subr.bf16.mxu1 %v1422_v0  ;;  %1100 = vmatprep.mubr.msk.bf16.mxu1 %vm1423_vm0, %v1422_v0  ;;  %s1426_s7 = smov 80   ;;  %s1427_s17 = smov 88   ;;  %vm395_vm2 = vcmask 64512   ;;  %vm460_vm4 = vcmask 1043456   ;;  %vm620_vm5 = vcmask 130112   ;;  %vm737_vm6 = vcmask 195712  }
  0x6c   : > { %1091 = vmatpush3.bf16.msra.mxu0 %v1239_v1  ;;  %s1428_s19 = smov 72   ;;  %s1429_s12 = smov 112   ;;  %vm854_vm7 = vcmask 261312  }
  0x6d   : > { %1092 = vmatprep.subr.bf16.mxu0 %v1422_v0  ;;  %s1430_s20 = smov 104   ;;  %p309_p11 = scmp.lt.s32.totalorder %s1495_s25, 1 }
  0x6e   : > { %s1431_s29 = smov 56   ;;  %s308_s13 = scalar_lea.vmem [#allocation9], %s1043_s30 }
  0x6f   : > { %s310_s15 = scalar_select %p309_p11, %s1495_s25, 1 }
  0x70   : > { %1093 = vmatpush3.bf16.msra.mxu0 %v1240_v2  ;;  %s934_s10 = sshll.u32 %s308_s13, 4  ;;  %p1826_p1 = scmp.ne.s32.totalorder %s1819_s9, 0  ;;  %s1761_s10 = int_to_ptr.vmem [resolvable:$true] %s934_s10 }
  0x71   : > { %1104 = vmatprep.subr.bf16.mxu0 %v1422_v0  ;;  %s1047_s8 = sshll.u32 %s310_s15, 1  ;;  %s1345_s30 = scalar_lea.vmem %s1761_s10, 128 }
  0x72   : > { %s312_s27 = scalar_lea.vmem %s1809_s5, %s1047_s8  ;;  %s1065_s8 = sshll.u32 %s1495_s25, 7 }
  0x73   : > { %1095 = vmatmul.mubr.msk.bf16.vlgmr.msra.gmra.mrb[0].mxu0 %vm339_vm1, %v315_v4  ;;  %v384_v23 = vld [vmem:[%s312_s27] sm:$0x3]  ;;  %s921_s25 = scalar_lea.sflag [#allocation5], %s1643_s18  ;;  %p1346_p0 = scmp.ne.s32.totalorder %s1761_s10, %s1345_s30 }
  0x74   : > { %1106 = vmatprep.mubr.msk.bf16.mxu0 %vm1423_vm0, %v1422_v0  ;;  %v385_v24 = vunpack.c.0.s8 %v384_v23 }
  0x75   : > { %p1347_p3 = pnand %p1346_p0, %p1826_p1 }
  0x76   : > { %vm1706_vm3 = vcmp.eq.s32.totalorder %v385_v24, 0 }
  0x77   : > { %p1348_p7 = pneg %p1347_p3 }
 0x146   : > { %v377_v6 = vpop.f32.mrb[0].mxu0 }
 0x147   : > { %v378_v7 = vadd.f32 %v1048_v5, %v377_v6  ;;  %v1096_v8 = vpop.f32.mrb[1].mxu0 }
 0x148   : > { %v380_v9 = vpop.f32.mrb[2].mxu0 }
 0x149   : > { %v1671_v10 = vpack.c.bf16 %v378_v7, %v378_v7  ;;  %v1097_v11 = vpop.f32.mrb[3].mxu0 }
 0x14b   : > { %505 = vrot.lane.b32.xlu1 %v1671_v10, %s1424_s14  ;;  %393 = vrot.lane.b32.xlu0 %v1671_v10, %s1425_s16  ;;  %s1432_s14 = smov 64   ;;  %s1433_s16 = smov 40  }
 0x14f   : > { %624 = vrot.lane.b32.xlu1 %v1671_v10, %s1426_s7  ;;  %507 = vrot.lane.b32.xlu0 %v1671_v10, %s1427_s17  ;;  %s1434_s7 = smov 48   ;;  %s1435_s17 = smov 8  }
 0x153   : > { %741 = vrot.lane.b32.xlu1 %v1671_v10, %s1428_s19  ;;  %622 = vrot.lane.b32.xlu0 %v1671_v10, %s1429_s12  ;;  %s1436_s19 = smov 16   ;;  %s1437_s12 = smov 24  }
 0x157   : > { %739 = vrot.lane.b32.xlu0 %v1671_v10, %s1430_s20 }
 0x1bd   : > { %v394_v12 = vpop.permute.xlu0 %393  ;;  %v506_v15 = vpop.permute.xlu1 %505 }
 0x1be   : > { %v400_v13 = vsel %vm395_vm2, %v394_v12, 0 }
 0x1bf   : > { %1099 = vmatpush3.bf16.xpose.msra.mxu1 %v400_v13 }
 0x1c0   : > { %1110 = vmatprep.subr.bf16.mxu1 %v1422_v0 }
 0x1c1   : > { %v508_v14 = vpop.permute.xlu0 %507  ;;  %v625_v17 = vpop.permute.xlu1 %624 }
 0x1c2   : > { %v513_v16 = vsel %vm395_vm2, %v508_v14, 0  ;;  %v630_v18 = vsel %vm395_vm2, %v625_v17, 0 }
 0x1c5   : > { %v742_v19 = vpop.permute.xlu1 %741  ;;  %v623_v20 = vpop.permute.xlu0 %622 }
 0x1c6   : > { %1101 = vmatmul.mubr.msk.bf16.vlgmr.msra.gmra.mrb[0].mxu1 %vm395_vm2, %v1671_v10  ;;  %v747_v21 = vsel %vm395_vm2, %v742_v19, 0 }
 0x1c7   : > { %1111 = vmatpush3.bf16.xpose.msra.mxu1 %v513_v16  ;;  %1112 = vmatprep.mubr.msk.bf16.mxu1 %vm1423_vm0, %v1422_v0 }
 0x1c8   : > { %1122 = vmatprep.subr.bf16.mxu1 %v1422_v0 }
 0x1c9   : > { %v740_v22 = vpop.permute.xlu0 %739 }
 0x1ce   : > { %1113 = vmatmul.mubr.msk.bf16.vlgmr.msra.gmra.mrb[4].mxu1 %vm395_vm2, %v506_v15 }
 0x1cf   : > { %1123 = vmatpush3.bf16.xpose.msra.mxu1 %v630_v18  ;;  %1124 = vmatprep.mubr.msk.bf16.mxu1 %vm1423_vm0, %v1422_v0 }
 0x1d0   : > { %1134 = vmatprep.subr.bf16.mxu1 %v1422_v0 }
 0x1d6   : > { %1125 = vmatmul.mubr.msk.bf16.vlgmr.msra.gmra.mrb[8].mxu1 %vm395_vm2, %v623_v20 }
 0x1d7   : > { %1135 = vmatpush3.bf16.xpose.msra.mxu1 %v747_v21  ;;  %1136 = vmatprep.mubr.msk.bf16.mxu1 %vm1423_vm0, %v1422_v0 }
 0x1d8   : > { %1146 = vmatprep.subr.bf16.mxu1 %v1422_v0 }
 0x1de   : > { %1137 = vmatmul.mubr.msk.bf16.vlgmr.msra.gmra.mrb[12].mxu1 %vm395_vm2, %v740_v22 }
 0x1df   : > { %1150 = vmatprep.mubr.msk.bf16.mxu1 %vm1423_vm0, %v1422_v0 }
 0x299   : > { %v436_v26 = vpop.f32.mrb[0].mxu1 }
 0x29a   : > { %v442_v27 = vsel %vm1706_vm3, -1.7677669e+08, %v436_v26  ;;  %v1102_v28 = vpop.f32.mrb[1].mxu1 }
 0x29b   : > { %v439_v29 = vpop.f32.mrb[2].mxu1  ;;  %v443_v30 = vsel %vm395_vm2, %v442_v27, -inf }
 0x29c   : > { %444 = vmax.xlane.f32.xlu1 %v443_v30  ;;  %v1103_v31 = vpop.f32.mrb[3].mxu1 }
 0x2a1   : > { %v549_v32 = vpop.f32.mrb[4].mxu1 }
 0x2a2   : > { %v555_v33 = vsel %vm1706_vm3, -1.7677669e+08, %v549_v32  ;;  %v1114_v34 = vpop.f32.mrb[5].mxu1 }
 0x2a3   : > { %v552_v35 = vpop.f32.mrb[6].mxu1  ;;  %v556_v36 = vsel %vm395_vm2, %v555_v33, -inf }
 0x2a4   : > { %557 = vmax.xlane.f32.xlu0 %v556_v36  ;;  %v1115_v37 = vpop.f32.mrb[7].mxu1 }
 0x2a9   : > { %v666_v38 = vpop.f32.mrb[8].mxu1 }
 0x2aa   : > { %v672_v39 = vsel %vm1706_vm3, -1.7677669e+08, %v666_v38  ;;  %v1126_v40 = vpop.f32.mrb[9].mxu1 }
 0x2ab   : > { %v669_v41 = vpop.f32.mrb[10].mxu1  ;;  %v673_v42 = vsel %vm395_vm2, %v672_v39, -inf  ;;  %v1242_v40 = vld [vmem:[#allocation8 + $0x8] sm:$0xff]  }
 0x2ac   : > { %674 = vmax.xlane.f32.xlu0 %v673_v42  ;;  %v1127_v43 = vpop.f32.mrb[11].mxu1 }
 0x2b1   : > { %v783_v44 = vpop.f32.mrb[12].mxu1 }
 0x2b2   : > { %v789_v45 = vsel %vm1706_vm3, -1.7677669e+08, %v783_v44  ;;  %v1138_v46 = vpop.f32.mrb[13].mxu1 }
 0x2b3   : > { %v786_v47 = vpop.f32.mrb[14].mxu1  ;;  %v790_v48 = vsel %vm395_vm2, %v789_v45, -inf }
 0x2b4   : > { %791 = vmax.xlane.f32.xlu1 %v790_v48  ;;  %v1139_v49 = vpop.f32.mrb[15].mxu1 }
 0x329   : > { %v445_v50 = vpop.xlane.xlu1 %444 }
 0x32a   : > { %v446_v51 = vsub.f32 %v442_v27, %v445_v50 }
 0x32c   : > { %v447_v52 = vmul.f32 1.442695, %v446_v51 }
 0x32e   : > { %1243 = vpow2.f32 %v447_v52 }
 0x331   : > { %v558_v53 = vpop.xlane.xlu0 %557 }
 0x332   : > { %v559_v54 = vsub.f32 %v555_v33, %v558_v53  ;;  %v1060_v53 = vld [vmem:[%s1808_s4] ss:$0 sm:$0xff] }
 0x334   : > { %v560_v55 = vmul.f32 1.442695, %v559_v54 }
 0x336   : > { %1245 = vpow2.f32 %v560_v55 }
 0x338   : > { %v1244_v56 = vpop.eup %1243 }
 0x339   : > { %v675_v57 = vpop.xlane.xlu0 %674  ;;  %v449_v58 = vsel %vm395_vm2, %v1244_v56, 0.0 }
 0x33a   : > { %v676_v59 = vsub.f32 %v672_v39, %v675_v57  ;;  %450 = vadd.xlane.f32.xlu0 %v449_v58  ;;  %v1241_v39 = vld [vmem:[#allocation8] sm:$0xff]  }
 0x33b   : > { %1147 = vmatpush3.bf16.msra.mxu1 %v1241_v39 }
 0x33c   : > { %v677_v60 = vmul.f32 1.442695, %v676_v59  ;;  %1148 = vmatprep.subr.bf16.mxu1 %v1422_v0 }
 0x33e   : > { %1247 = vpow2.f32 %v677_v60 }
 0x33f   : > { %1149 = vmatpush3.bf16.msra.mxu1 %v1242_v40 }
 0x340   : > { %v1246_v61 = vpop.eup %1245 }
 0x341   : > { %v562_v62 = vsel %vm395_vm2, %v1246_v61, 0.0  ;;  %v792_v2 = vpop.xlane.xlu1 %791 }
 0x342   : > { %563 = vadd.xlane.f32.xlu1 %v562_v62  ;;  %v793_v3 = vsub.f32 %v789_v45, %v792_v2 }
 0x344   : > { %v794_v4 = vmul.f32 1.442695, %v793_v3 }
 0x346   : > { %1249 = vpow2.f32 %v794_v4 }
 0x348   : > { %v1248_v63 = vpop.eup %1247 }
 0x349   : > { %v679_v1 = vsel %vm395_vm2, %v1248_v63, 0.0 }
 0x34a   : > { %680 = vadd.xlane.f32.xlu0 %v679_v1 }
 0x350   : > { %v1250_v5 = vpop.eup %1249 }
 0x351   : > { %v796_v6 = vsel %vm395_vm2, %v1250_v5, 0.0 }
 0x353   : > { %568 = vrot.lane.b32.xlu1 %v1671_v10, %s1431_s29 }
 0x360   : > { %455 = vrot.lane.b32.xlu0 %v1671_v10, %s1432_s14  ;;  %s1759_s14 = scalar_lea.hbm %s1810_s6, %s1065_s8 }
 0x364   : > { %802 = vrot.lane.b32.xlu0 %v1671_v10, %s1433_s16  ;;  %s1438_s16 = smov [#allocation9]  }
 0x377   : > { %797 = vadd.xlane.f32.xlu1 %v796_v6 }
 0x388   : > { %685 = vrot.lane.b32.xlu1 %v1671_v10, %s1434_s7  ;;  %s1349_s7 = sshll.u32 %s1438_s16, 4  ;;  %s1350_s7 = int_to_ptr.vmem [resolvable:$false] %s1349_s7 }
 0x389   : > { %p1352_p9 = scmp.lt.s32.totalorder %s1761_s10, %s1350_s7 }
 0x3c7   : > { %v451_v7 = vpop.xlane.xlu0 %450 }
 0x3c8   : > { %1251 = vrcp.f32 %v451_v7 }
 0x3cf   : > { %v564_v8 = vpop.xlane.xlu1 %563 }
 0x3d0   : > { %1253 = vrcp.f32 %v564_v8 }
 0x3d2   : > { %v1252_v9 = vpop.eup %1251 }
 0x3d3   : > { %v453_v12 = vmul.f32 %v1252_v9, %v1244_v56  ;;  %v569_v15 = vpop.permute.xlu1 %568 }
 0x3d4   : > { %v574_v18 = vsel %vm460_vm4, %v569_v15, 0 }
 0x3d5   : > { %v454_v16 = vpack.c.bf16 %v453_v12, %v453_v12 }
 0x3d7   : > { %v681_v11 = vpop.xlane.xlu0 %680 }
 0x3d8   : > { %1255 = vrcp.f32 %v681_v11 }
 0x3da   : > { %v1254_v17 = vpop.eup %1253 }
 0x3db   : > { %v456_v13 = vpop.permute.xlu0 %455  ;;  %v566_v10 = vmul.f32 %v1254_v17, %v1246_v61 }
 0x3dc   : > { %v462_v14 = vsel %vm460_vm4, %v456_v13, 0 }
 0x3dd   : > { %1105 = vmatpush3.bf16.msra.mxu0 %v462_v14  ;;  %v567_v19 = vpack.c.bf16 %v566_v10, %v566_v10 }
 0x3de   : > { %1116 = vmatprep.subr.bf16.mxu0 %v1422_v0 }
 0x3df   : > { %v803_v25 = vpop.permute.xlu0 %802 }
 0x3e0   : > { %1107 = vmatmul.mubr.msk.bf16.vlgmr.msra.gmra.mrb[4].mxu0 %vm395_vm2, %v454_v16  ;;  %v808_v27 = vsel %vm460_vm4, %v803_v25, 0 }
 0x3e1   : > { %1117 = vmatpush3.bf16.msra.mxu0 %v574_v18  ;;  %1118 = vmatprep.mubr.msk.bf16.mxu0 %vm1423_vm0, %v1422_v0 }
 0x3e2   : > { %1128 = vmatprep.subr.bf16.mxu0 %v1422_v0  ;;  %v1256_v20 = vpop.eup %1255 }
 0x3e3   : > { %v683_v22 = vmul.f32 %v1256_v20, %v1248_v63 }
 0x3e5   : > { %v684_v26 = vpack.c.bf16 %v683_v22, %v683_v22 }
 0x3e8   : > { %1119 = vmatmul.mubr.msk.bf16.vlgmr.msra.gmra.mrb[8].mxu0 %vm395_vm2, %v567_v19 }
 0x3e9   : > { %1130 = vmatprep.mubr.msk.bf16.mxu0 %vm1423_vm0, %v1422_v0 }
 0x404   : > { %v798_v21 = vpop.xlane.xlu1 %797 }
 0x405   : > { %1257 = vrcp.f32 %v798_v21 }
 0x408   : > { %v686_v23 = vpop.permute.xlu1 %685 }
 0x409   : > { %v691_v24 = vsel %vm460_vm4, %v686_v23, 0 }
 0x40a   : > { %1129 = vmatpush3.bf16.msra.mxu0 %v691_v24 }
 0x40b   : > { %1140 = vmatprep.subr.bf16.mxu0 %v1422_v0 }
 0x40d   : > { %1131 = vmatmul.mubr.msk.bf16.vlgmr.msra.gmra.mrb[12].mxu0 %vm395_vm2, %v684_v26 }
 0x40e   : > { %1141 = vmatpush3.bf16.msra.mxu0 %v808_v27  ;;  %1142 = vmatprep.mubr.msk.bf16.mxu0 %vm1423_vm0, %v1422_v0 }
 0x40f   : > { %v1258_v28 = vpop.eup %1257 }
 0x410   : > { %v800_v29 = vmul.f32 %v1258_v28, %v1250_v5 }
 0x412   : > { %v801_v30 = vpack.c.bf16 %v800_v29, %v800_v29 }
 0x415   : > { %1143 = vmatmul.mubr.msk.bf16.vlgmr.msra.gmra.mrb[16].mxu0 %vm395_vm2, %v801_v30 }
 0x4b3   : > { %v498_v31 = vpop.f32.mrb[4].mxu0 }
 0x4b4   : > { %504 = vst.msk [vmem:[#allocation2] sm:$0xff] %vm395_vm2, %v498_v31  ;;  %v1108_v32 = vpop.f32.mrb[5].mxu0 }
 0x4b5   : > { %v501_v33 = vpop.f32.mrb[6].mxu0 }
 0x4b6   : > { %v1109_v34 = vpop.f32.mrb[7].mxu0 }
 0x4bb   : > { %v610_v35 = vpop.f32.mrb[8].mxu0 }
 0x4bc   : > { %617 = vrot.lane.b32.xlu1 %v610_v35, %s1435_s17  ;;  %v1120_v36 = vpop.f32.mrb[9].mxu0  ;;  %s1351_s17 = scalar_lea.vmem %s1350_s7, 256 }
 0x4bd   : > { %v613_v37 = vpop.f32.mrb[10].mxu0  ;;  %p1353_p12 = scmp.lt.s32.totalorder %s1351_s17, %s1345_s30 }
 0x4be   : > { %v1121_v38 = vpop.f32.mrb[11].mxu0 }
 0x4bf   : > { %p1354_p2 = por %p1353_p12, %p1352_p9 }
 0x4c1   : > { %p1355_p13 = pnand %p1354_p2, %p1348_p7 }
 0x4e0   : > { %v727_v41 = vpop.f32.mrb[12].mxu0 }
 0x4e1   : > { %734 = vrot.lane.b32.xlu0 %v727_v41, %s1436_s19  ;;  %v1132_v42 = vpop.f32.mrb[13].mxu0 }
 0x4e2   : > { %v730_v43 = vpop.f32.mrb[14].mxu0 }
 0x4e3   : > { %v1133_v44 = vpop.f32.mrb[15].mxu0 }
 0x4e8   : > { %v844_v45 = vpop.f32.mrb[16].mxu0 }
 0x4e9   : > { %851 = vrot.lane.b32.xlu1 %v844_v45, %s1437_s12  ;;  %v1144_v46 = vpop.f32.mrb[17].mxu0 }
 0x4ea   : > { %v847_v47 = vpop.f32.mrb[18].mxu0 }
 0x4eb   : > { %v1145_v48 = vpop.f32.mrb[19].mxu0 }
 0x52e   : > { %v618_v49 = vpop.permute.xlu1 %617 }
 0x52f   : > { %621 = vst.msk [vmem:[#allocation2] sm:$0xff] %vm620_vm5, %v618_v49 }
 0x553   : > { %v735_v0 = vpop.permute.xlu0 %734 }
 0x554   : > { %738 = vst.msk [vmem:[#allocation2] sm:$0xff] %vm737_vm6, %v735_v0 }
 0x55b   : > { %v852_v50 = vpop.permute.xlu1 %851 }
 0x55c   : > { %855 = vst.msk [vmem:[#allocation2] sm:$0xff] %vm854_vm7, %v852_v50 }
 0x563   : > { %v856_v51 = vld [vmem:[#allocation2] sm:$0xff] }
 0x564   : > { %v857_v52 = vpack.c.bf16 %v856_v51, %v856_v51 }
 0x566   : > { %1151 = vmatmul.mubr.msk.bf16.vlgmr.msra.gmra.mrb[16].mxu1 %vm339_vm1, %v857_v52 }
 0x639   : > { %v913_v54 = vpop.f32.mrb[16].mxu1 }
 0x63a   : > { %v914_v55 = vadd.f32 %v1060_v53, %v913_v54  ;;  %v1152_v56 = vpop.f32.mrb[17].mxu1 }
 0x63b   : > { %v916_v57 = vpop.f32.mrb[18].mxu1 }
 0x63c   : > { %v1153_v58 = vpop.f32.mrb[19].mxu1  ;;  %919 = vst.msk [vmem:[%s308_s13] sm:$0xff] %vm339_vm1, %v914_v55 }
 0x63d   : > { %1358 = shalt.err (!%p1355_p13)
}
 0x63e   : > { %s1359_s18 = scalar_lea.hbm %s1759_s14, 128  ;;  %s1363_s20 = scalar_lea.hbm %s1810_s6, 256 }
 0x63f   : > { %p1360_p6 = scmp.ne.s32.totalorder %s1759_s14, %s1359_s18  ;;  %p1364_p5 = scmp.lt.u32.totalorder %s1759_s14, %s1810_s6 }
 0x640   : > { %p1365_p8 = scmp.lt.u32.totalorder %s1363_s20, %s1359_s18  ;;  %p1367_p0 = scmp.lt.u32.totalorder %s1359_s18, %s1759_s14 }
 0x641   : > { %p1361_p10 = pnand %p1360_p6, %p1826_p1 }
 0x642   : > { %p1366_p11 = por %p1365_p8, %p1364_p5 }
 0x643   : > { %p1362_p4 = pneg %p1361_p10 }
 0x644   : > { %p1368_p3 = por %p1367_p0, %p1366_p11 }
 0x646   : > { %p1369_p7 = pnand %p1368_p3, %p1362_p4 }
 0x648   : > { %1372 = shalt.err (!%p1369_p7)
}
 0x649   : > { %1164 = dma.vmem_to_hbm [thread:$0]  (%p1826_p1), %s1761_s10, 128, %s1759_s14, %s921_s25  }
 0x64a PF: > { %s946_s13 = sand.u32 1, %s1403_s21   ;;  %p1827_p9 = scmp.ne.s32.totalorder %s1815_s28, 0 }
 0x64b   : > { %p1828_p12 = scmp.ge.s32.totalorder %s1415_s24, 2  ;;  %s947_s27 = scalar_lea.sflag [#allocation5], %s946_s13 }
 0x64d   : > { %p1178_p2 = pnand %p1828_p12, %p1827_p9 }
 0x64f   : > { %1398 = dma.done.wait (!%p1178_p2), %s947_s27, 128  }
 0x650   : > { %1400 = vsyncadd (!%p1178_p2), %s947_s27, 4294967168  ;;  %p20_p13 = scmp.ge.s32.totalorder %s1584_s26, 4   ;;  %s1829_s21 = smov %s1407_s22 }
 0x651   : > { %s1830_s22 = smov %s1411_s23  ;;  %s1831_s23 = smov %s1600_s11 }
 0x652   : > { %s1832_s24 = smov %s1584_s26  ;;  %22 = sbr.rel (!%p20_p13) target bundleno = 6 (0x6), region = 100 }
 0x659   :  { %952 = vsyncpa [#allocation4], 1 }
 0x65a   :  { %954 = vsyncpa [#allocation4 + $0x1], 1 }
 0x65b   :  { %955 = vsyncpa [#allocation7], 1 }
 0x65c   :  { %956 = vsyncpa [#allocation5], 1 }
 0x65d   :  { %958 = vsyncpa [#allocation5 + $0x1], 1 }

</bundles_post_ra>
